<compile_context>
chip_gen: v7x
topology: tpu7x:2x2x1
jax: 0.10.0
libtpu: 0.0.40
codegen_flags: <defaults>
</compile_context>

<pallas_src>
import jax
import jax.numpy as jnp
import numpy as np
from jax.experimental import pallas as pl
from jax.experimental.pallas import tpu as pltpu

VAR_MARGIN = 1.0   # var_margin in sample_loss
DIST_MARGIN = 3.0  # dist_margin in sample_loss
ALPHA = 1.0
BETA = 1.0


def _embitter_stats_kernel(y_ref, c_ref, s_ref, n_ref):
    """Accumulate per-label masked statistics for one (sample, spatial chunk).

    y_ref: VMEM (1, C, TP) f32  — embedding tile
    c_ref: VMEM (1, 1, TP) i32  — compact label ids in {-1, 0..K-1}
    s_ref: VMEM (1, 2C, K) f32  — rows 0..C-1: sum y, rows C..2C-1: sum y*y
    n_ref: VMEM (1, K, 1) f32   — per-label pixel counts
    """
    j = pl.program_id(2)

    @pl.when(j == 0)
    def _init():
        s_ref[...] = jnp.zeros_like(s_ref)
        n_ref[...] = jnp.zeros_like(n_ref)

    y = y_ref[0]                                   # (C, TP)
    c = c_ref[0]                                   # (1, TP)
    C = y.shape[0]
    K = n_ref.shape[1]
    TP = y.shape[1]

    # (K, TP) one-hot label mask; -1 (unlabeled / spatial padding) matches no row.
    lab = jax.lax.broadcasted_iota(jnp.int32, (K, TP), 0)
    mask = (c == lab).astype(jnp.float32)

    # Per-label masked statistics on the MXU, contracting over the spatial axis
    # (A @ B^T form, dn = (((1,),(1,)),((),())) — no per-tile transpose needed).
    dn = (((1,), (1,)), ((), ()))
    s_blk = jax.lax.dot_general(y, mask, dn,
                                preferred_element_type=jnp.float32)        # (C, K)
    s2_blk = jax.lax.dot_general(y * y, mask, dn,
                                 preferred_element_type=jnp.float32)       # (C, K)
    n_blk = jnp.sum(mask, axis=1, keepdims=True)                           # (K, 1)

    s_ref[0] = s_ref[0] + jnp.concatenate([s_blk, s2_blk], axis=0)
    n_ref[0] = n_ref[0] + n_blk


def _round_up(x, m):
    return -(-x // m) * m


def _tpu_params():
    """Return (vmem_capacity_bytes, tensorcores_per_chip), conservative fallbacks."""
    kind = ""
    try:
        kind = jax.devices()[0].device_kind.lower()
    except Exception:
        pass
    vmem_cap = None
    try:
        vmem_cap = int(pltpu.get_tpu_info().vmem_capacity_bytes)
    except Exception:
        vmem_cap = None
    if vmem_cap is None:
        # v5e / v6e carry 128 MiB VMEM; default conservatively to v7x's 64 MiB.
        if ("v7" not in kind) and any(t in kind for t in ("v5", "v6")):
            vmem_cap = 128 << 20
        else:
            vmem_cap = 64 << 20
    two_core = ("v7" in kind) or (vmem_cap <= (64 << 20))
    return vmem_cap, (2 if two_core else 1)


def embitter_loss(y, c, labels, tile_p=None, spatial_splits=None):
    """y: (B, C, H, W) float, c: (B, 1, H, W) int labels, labels: (K,) int.

    Returns alpha * var_loss + beta * dist_loss (the gamma * reg term is not
    used by EmbitterLoss.forward).
    """
    y = jnp.asarray(y, jnp.float32)
    B, C, H, W = y.shape
    P = H * W
    y_flat = y.reshape(B, C, P)
    c_flat = jnp.asarray(c, jnp.int32).reshape(B, 1, P)

    labels = jnp.asarray(labels, jnp.int32).reshape(-1)
    K = int(labels.shape[0])

    # Remap arbitrary label values to compact ids {0..K-1}; skipped entirely
    # when labels are already arange(K) (the common case).
    need_remap = True
    try:
        need_remap = not np.array_equal(np.asarray(labels), np.arange(K))
    except Exception:
        need_remap = True
    if need_remap:
        onehot = c_flat[..., None] == labels                         # (B,1,P,K)
        c_flat = jnp.where(onehot.any(-1),
                           jnp.argmax(onehot, axis=-1), -1).astype(jnp.int32)

    # --- Generation-aware VMEM budget & spatial tile -------------------------
    vmem_cap, num_cores = _tpu_params()
    if vmem_cap <= (64 << 20):          # v7x-class: 64 MiB physical VMEM
        work_budget = 22 << 20
        vmem_limit = 28 << 20
    else:                               # v5e / v6e: 128 MiB physical VMEM
        work_budget = 80 << 20
        vmem_limit = 100 << 20

    # Bytes per spatial column: double-buffered y and c tiles (sublane-padded)
    # plus in-kernel mask / y*y / compare temporaries.
    Cp = _round_up(C, 8)
    Kp = _round_up(K, 8)
    bytes_per_col = 4 * (2 * Cp + 2 * 8 + Cp + 2 * Kp)
    tp_max = max(128, (work_budget // bytes_per_col) // 128 * 128)

    P_pad = _round_up(P, 128)

    S = spatial_splits
    if S is None:
        # Split the spatial reduction across both TensorCores (v7x) when the
        # batch axis alone cannot keep them busy.
        S = 2 if (num_cores >= 2 and B % 2 == 1 and P_pad >= 256) else 1
    S = int(S)

    if tile_p is not None:
        tp = int(tile_p)
        assert tp % 128 == 0, "tile_p must be a multiple of 128"
        n_inner = max(1, _round_up(P_pad, S * tp) // (S * tp))
    else:
        n_inner = max(1, -(-P_pad // (S * tp_max)))
        tp = _round_up(-(-P_pad // (S * n_inner)), 128)

    P_final = S * n_inner * tp
    if P_final != P:
        y_flat = jnp.pad(y_flat, ((0, 0), (0, 0), (0, P_final - P)))
        c_flat = jnp.pad(c_flat, ((0, 0), (0, 0), (0, P_final - P)),
                         constant_values=-1)

    grid_spec = pltpu.PrefetchScalarGridSpec(
        num_scalar_prefetch=0,
        grid=(B, S, n_inner),                   # reduction (spatial) axis last
        in_specs=[
            # TODO(synk): consider pipeline_mode=pl.Buffered(3) for y on v5e if
            # profiling shows exposed DMA (slower HBM, more latency jitter).
            pl.BlockSpec((1, C, tp), lambda b, s, j: (b, 0, s * n_inner + j)),
            pl.BlockSpec((1, 1, tp), lambda b, s, j: (b, 0, s * n_inner + j)),
        ],
        out_specs=[
            pl.BlockSpec((1, 2 * C, K), lambda b, s, j: (b * S + s, 0, 0)),
            pl.BlockSpec((1, K, 1), lambda b, s, j: (b * S + s, 0, 0)),
        ],
    )
    stats, counts = pl.pallas_call(
        _embitter_stats_kernel,
        out_shape=(jax.ShapeDtypeStruct((B * S, 2 * C, K), jnp.float32),
                   jax.ShapeDtypeStruct((B * S, K, 1), jnp.float32)),
        grid_spec=grid_spec,
        compiler_params=pltpu.CompilerParams(
            dimension_semantics=("parallel", "parallel", "arbitrary"),
            vmem_limit_bytes=int(vmem_limit),
        ),
    )(y_flat, c_flat)

    # --- Finalize (exact division, hinges, roll, means) on tiny partials -----
    stats = stats.reshape(B, S, 2 * C, K).sum(axis=1)       # (B, 2C, K)
    n = counts.reshape(B, S, K).sum(axis=1)                 # (B, K)
    s = stats[:, :C, :]                                     # (B, C, K)
    q = jnp.sum(stats[:, C:, :], axis=1)                    # (B, K)

    n_safe = jnp.maximum(n, 1.0)                            # guard absent labels
    cent = s / n_safe[:, None, :]                           # (B, C, K) centroids

    # hinge-var: relu(||obj - centroid||_F - margin)^2, mean over labels.
    # TODO(synk): q - ||s||^2/n can lose precision when the within-class spread
    # is tiny relative to the class-mean magnitude; center y per sample before
    # accumulation if that regime matters in production.
    within = jnp.maximum(q - jnp.sum(s * s, axis=1) / n_safe, 0.0)      # (B, K)
    frob = jnp.sqrt(within)
    var_loss = jnp.mean(jnp.maximum(frob - VAR_MARGIN, 0.0) ** 2, axis=1)

    # hinge-dist: relu(margin - ||c_k - c_{(k-1) % K}||_2)^2, mean over labels.
    if K > 1:
        diff = cent - jnp.roll(cent, shift=1, axis=2)
        dist = jnp.sqrt(jnp.sum(diff * diff, axis=1))                   # (B, K)
        dis_loss = jnp.mean(jnp.maximum(DIST_MARGIN - dist, 0.0) ** 2, axis=1)
    else:
        dis_loss = jnp.zeros((B,), jnp.float32)

    return ALPHA * jnp.mean(var_loss) + BETA * jnp.mean(dis_loss)


def _reference_loss(y, c, labels):
    """Pure-numpy re-implementation of EmbitterLoss.forward for checking."""
    y = np.asarray(y, np.float32)
    c = np.asarray(c)
    B, C, H, W = y.shape
    var_list, dis_list = [], []
    K = len(labels)
    for b in range(B):
        yb = y[b].reshape(C, -1)
        cb = c[b, 0].reshape(-1)
        cents, vs = [], []
        for lab in labels:
            m = cb == lab
            obj = yb[:, m]
            cent = obj.mean(axis=1, keepdims=True)
            frob = np.linalg.norm(cent - obj)
            vs.append(max(frob - VAR_MARGIN, 0.0) ** 2)
            cents.append(cent)
        var_list.append(np.mean(vs))
        if K > 1:
            ds = []
            for k in range(K):
                prev = cents[(k - 1) % K]
                d = np.linalg.norm(cents[k] - prev)
                ds.append(max(DIST_MARGIN - d, 0.0) ** 2)
            dis_list.append(np.mean(ds))
        else:
            dis_list.append(0.0)
    return ALPHA * np.mean(var_list) + BETA * np.mean(dis_list)


if __name__ == "__main__":
    # Test 1: canonical small shapes (B=2, C=4, H=W=16), labels = arange(3).
    B, C, H, W = 2, 4, 16, 16
    K = 3  # labels {0,1,2}; -1 marks unlabeled pixels (excluded, as in torch)

    key = jax.random.PRNGKey(0)
    ky, kc, ky2, kc2 = jax.random.split(key, 4)
    y = jax.random.normal(ky, (B, C, H, W), dtype=jnp.float32)
    c = jax.random.randint(kc, (B, 1, H, W), minval=-1, maxval=K, dtype=jnp.int32)
    # Guarantee every label is present in every sample (fixed label-set assumption).
    c = c.at[:, :, 0, 0].set(0)
    c = c.at[:, :, 0, 1].set(1)
    c = c.at[:, :, 0, 2].set(2)
    labels = jnp.arange(K, dtype=jnp.int32)

    ref = _reference_loss(y, c, list(range(K)))

    # Auto tiling (single spatial step per sample) ...
    out_auto = jax.block_until_ready(embitter_loss(y, c, labels))
    # ... and a forced 128-wide tile with a 2-way spatial split (exercises the
    # multi-chunk accumulation + parallel-split path used on v7x).
    out_split = jax.block_until_ready(
        embitter_loss(y, c, labels, tile_p=128, spatial_splits=2))

    np.testing.assert_allclose(np.asarray(out_auto), ref, rtol=2e-3, atol=1e-3)
    np.testing.assert_allclose(np.asarray(out_split), ref, rtol=2e-3, atol=1e-3)

    # Test 2: non-128-divisible spatial size and non-contiguous label values
    # (exercises the -1 spatial padding and the label remap paths).
    B2, C2, H2, W2 = 1, 4, 10, 13
    labels2_np = [2, 5, 9]
    labels2 = jnp.asarray(labels2_np, dtype=jnp.int32)
    idx = jax.random.randint(kc2, (B2, 1, H2, W2), minval=0, maxval=4,
                             dtype=jnp.int32)
    c2 = jnp.asarray([-1, 2, 5, 9], dtype=jnp.int32)[idx]
    c2 = c2.at[:, :, 0, 0].set(2)
    c2 = c2.at[:, :, 0, 1].set(5)
    c2 = c2.at[:, :, 0, 2].set(9)
    y2 = jax.random.normal(ky2, (B2, C2, H2, W2), dtype=jnp.float32)

    ref2 = _reference_loss(y2, c2, labels2_np)
    out2 = jax.block_until_ready(embitter_loss(y2, c2, labels2))
    np.testing.assert_allclose(np.asarray(out2), ref2, rtol=2e-3, atol=1e-3)

    print("KERNEL_OK")
</pallas_src>

<mosaic_0001>
module attributes {stable_mosaic.version = 11 : i64} {
  func.func @_embitter_stats_kernel(%arg0: i32, %arg1: i32, %arg2: i32, %arg3: memref<1x4x256xf32, #tpu.memory_space<vmem>>, %arg4: memref<1x1x256xi32, #tpu.memory_space<vmem>>, %arg5: memref<1x8x3xf32, #tpu.memory_space<vmem>>, %arg6: memref<1x3x1xf32, #tpu.memory_space<vmem>>) attributes {dimension_semantics = [#tpu.dimension_semantics<parallel>, #tpu.dimension_semantics<parallel>, #tpu.dimension_semantics<arbitrary>], iteration_bounds = array<i64: 2, 1, 1>, scalar_prefetch = 0 : i64, scratch_operands = 0 : i64, tpu.core_type = #tpu.core_type<tc>, window_params = [{transform_indices = @transform_0, window_bounds = array<i64: 1, 4, 256>}, {transform_indices = @transform_1, window_bounds = array<i64: 1, 1, 256>}, {transform_indices = @transform_2, window_bounds = array<i64: 1, 8, 3>}, {transform_indices = @transform_3, window_bounds = array<i64: 1, 3, 1>}]} {
    %c0_i32 = arith.constant 0 : i32
    %0 = arith.cmpi eq, %arg2, %c0_i32 : i32
    %1 = arith.extui %0 : i1 to i32
    %c0_i32_0 = arith.constant 0 : i32
    %2 = arith.cmpi ne, %1, %c0_i32_0 : i32
    scf.if %2 {
      %cst_20 = arith.constant 0.000000e+00 : f32
      %30 = vector.broadcast %cst_20 : f32 to vector<1x8x3xf32>
      %c0_21 = arith.constant 0 : index
      %c0_22 = arith.constant 0 : index
      %c0_23 = arith.constant 0 : index
      %31 = vector.load %arg5[%c0_21, %c0_22, %c0_23] : memref<1x8x3xf32, #tpu.memory_space<vmem>>, vector<1x8x3xf32>
      tpu.vector_store %arg5[%c0_21, %c0_22, %c0_23], %30 {strides = array<i32>} : memref<1x8x3xf32, #tpu.memory_space<vmem>>, vector<1x8x3xf32>,
      %cst_24 = arith.constant 0.000000e+00 : f32
      %32 = vector.broadcast %cst_24 : f32 to vector<1x3x1xf32>
      %c0_25 = arith.constant 0 : index
      %c0_26 = arith.constant 0 : index
      %c0_27 = arith.constant 0 : index
      %33 = vector.load %arg6[%c0_25, %c0_26, %c0_27] : memref<1x3x1xf32, #tpu.memory_space<vmem>>, vector<1x3x1xf32>
      tpu.vector_store %arg6[%c0_25, %c0_26, %c0_27], %32 {strides = array<i32>} : memref<1x3x1xf32, #tpu.memory_space<vmem>>, vector<1x3x1xf32>,
    } else {
    }
    %c0 = arith.constant 0 : index
    %c0_1 = arith.constant 0 : index
    %c0_2 = arith.constant 0 : index
    %3 = vector.load %arg3[%c0, %c0_1, %c0_2] : memref<1x4x256xf32, #tpu.memory_space<vmem>>, vector<1x4x256xf32>
    %4 = vector.shape_cast %3 : vector<1x4x256xf32> to vector<4x256xf32>
    %c0_3 = arith.constant 0 : index
    %c0_4 = arith.constant 0 : index
    %c0_5 = arith.constant 0 : index
    %5 = vector.load %arg4[%c0_3, %c0_4, %c0_5] : memref<1x1x256xi32, #tpu.memory_space<vmem>>, vector<1x1x256xi32>
    %6 = vector.shape_cast %5 : vector<1x1x256xi32> to vector<1x256xi32>
    %7 = tpu.iota {dimensions = array<i32: 0>} : vector<3x256xi32>
    %8 = vector.broadcast %6 : vector<1x256xi32> to vector<3x256xi32>
    %9 = arith.cmpi eq, %8, %7 : vector<3x256xi32>
    %10 = arith.extui %9 : vector<3x256xi1> to vector<3x256xi32>
    %11 = arith.sitofp %10 : vector<3x256xi32> to vector<3x256xf32>
    %cst = arith.constant dense<0.000000e+00> : vector<4x3xf32>
    %12 = tpu.matmul %4, %11, %cst {dimension_numbers = #tpu.dot_dimension_numbers<[1], [1], [0], [0], [0, 0, 1, 0], [], []>} : vector<4x256xf32>, vector<3x256xf32>, vector<4x3xf32> -> vector<4x3xf32>
    %13 = arith.mulf %4, %4 : vector<4x256xf32>
    %cst_6 = arith.constant dense<0.000000e+00> : vector<4x3xf32>
    %14 = tpu.matmul %13, %11, %cst_6 {dimension_numbers = #tpu.dot_dimension_numbers<[1], [1], [0], [0], [0, 0, 1, 0], [], []>} : vector<4x256xf32>, vector<3x256xf32>, vector<4x3xf32> -> vector<4x3xf32>
    %cst_7 = arith.constant dense<0.000000e+00> : vector<3xf32>
    %15 = vector.multi_reduction <add>, %11, %cst_7 [1] : vector<3x256xf32> to vector<3xf32>
    %16 = vector.shape_cast %15 : vector<3xf32> to vector<3x1xf32>
    %c0_8 = arith.constant 0 : index
    %c0_9 = arith.constant 0 : index
    %c0_10 = arith.constant 0 : index
    %17 = vector.load %arg5[%c0_8, %c0_9, %c0_10] : memref<1x8x3xf32, #tpu.memory_space<vmem>>, vector<1x8x3xf32>
    %18 = vector.shape_cast %17 : vector<1x8x3xf32> to vector<8x3xf32>
    %19 = tpu.concatenate %12, %14 in 0 : vector<4x3xf32>, vector<4x3xf32> -> vector<8x3xf32>
    %20 = arith.addf %18, %19 : vector<8x3xf32>
    %c0_11 = arith.constant 0 : index
    %c0_12 = arith.constant 0 : index
    %c0_13 = arith.constant 0 : index
    %21 = vector.load %arg5[%c0_11, %c0_12, %c0_13] : memref<1x8x3xf32, #tpu.memory_space<vmem>>, vector<1x8x3xf32>
    %22 = vector.shape_cast %21 : vector<1x8x3xf32> to vector<8x3xf32>
    %23 = vector.shape_cast %20 : vector<8x3xf32> to vector<1x8x3xf32>
    tpu.vector_store %arg5[%c0_11, %c0_12, %c0_13], %23 {strides = array<i32>} : memref<1x8x3xf32, #tpu.memory_space<vmem>>, vector<1x8x3xf32>,
    %c0_14 = arith.constant 0 : index
    %c0_15 = arith.constant 0 : index
    %c0_16 = arith.constant 0 : index
    %24 = vector.load %arg6[%c0_14, %c0_15, %c0_16] : memref<1x3x1xf32, #tpu.memory_space<vmem>>, vector<1x3x1xf32>
    %25 = vector.shape_cast %24 : vector<1x3x1xf32> to vector<3x1xf32>
    %26 = arith.addf %25, %16 : vector<3x1xf32>
    %c0_17 = arith.constant 0 : index
    %c0_18 = arith.constant 0 : index
    %c0_19 = arith.constant 0 : index
    %27 = vector.load %arg6[%c0_17, %c0_18, %c0_19] : memref<1x3x1xf32, #tpu.memory_space<vmem>>, vector<1x3x1xf32>
    %28 = vector.shape_cast %27 : vector<1x3x1xf32> to vector<3x1xf32>
    %29 = vector.shape_cast %26 : vector<3x1xf32> to vector<1x3x1xf32>
    tpu.vector_store %arg6[%c0_17, %c0_18, %c0_19], %29 {strides = array<i32>} : memref<1x3x1xf32, #tpu.memory_space<vmem>>, vector<1x3x1xf32>,
    return
  }
  func.func @transform_0(%arg0: i32, %arg1: i32, %arg2: i32) -> (i32, i32, i32) {
    %c1_i32 = arith.constant 1 : i32
    %0 = arith.muli %arg1, %c1_i32 : i32
    %1 = arith.addi %0, %arg2 : i32
    %c0_i32 = arith.constant 0 : i32
    %c0_i32_0 = arith.constant 0 : i32
    return %arg0, %c0_i32, %1 : i32, i32, i32
  }
  func.func @transform_1(%arg0: i32, %arg1: i32, %arg2: i32) -> (i32, i32, i32) {
    %c1_i32 = arith.constant 1 : i32
    %0 = arith.muli %arg1, %c1_i32 : i32
    %1 = arith.addi %0, %arg2 : i32
    %c0_i32 = arith.constant 0 : i32
    %c0_i32_0 = arith.constant 0 : i32
    return %arg0, %c0_i32, %1 : i32, i32, i32
  }
  func.func @transform_2(%arg0: i32, %arg1: i32, %arg2: i32) -> (i32, i32, i32) {
    %c1_i32 = arith.constant 1 : i32
    %0 = arith.muli %arg0, %c1_i32 : i32
    %1 = arith.addi %0, %arg1 : i32
    %c0_i32 = arith.constant 0 : i32
    %c0_i32_0 = arith.constant 0 : i32
    %c0_i32_1 = arith.constant 0 : i32
    return %1, %c0_i32, %c0_i32_0 : i32, i32, i32
  }
  func.func @transform_3(%arg0: i32, %arg1: i32, %arg2: i32) -> (i32, i32, i32) {
    %c1_i32 = arith.constant 1 : i32
    %0 = arith.muli %arg0, %c1_i32 : i32
    %1 = arith.addi %0, %arg1 : i32
    %c0_i32 = arith.constant 0 : i32
    %c0_i32_0 = arith.constant 0 : i32
    %c0_i32_1 = arith.constant 0 : i32
    return %1, %c0_i32, %c0_i32_0 : i32, i32, i32
  }
}

</mosaic_0001>

<bundles_post_ra>
// kernel: tpu_custom_call.1
= control target key start
LH: loop header
LB: loop body
LE: loop exit
PB: predicated region body
PF: predicated region fallthrough
CT: control target
= control target key end

     0   :  { %9 = vsyncpa [#allocation3], 0  ;;  %s1018_s0 = inlined_call_operand.hbm [shape: f32[2,4,256], index: 0, kind: input, shape index: {}]   ;;  %s1019_s1 = inlined_call_operand.hbm [shape: s32[2,1,256], index: 1, kind: input, shape index: {}]   ;;  %s1020_s2 = inlined_call_operand.vmem [shape: f32[2,8,3], index: 2, kind: output, shape index: {0}]   ;;  %s1021_s3 = inlined_call_operand.vmem [shape: f32[2,3,1], index: 3, kind: output, shape index: {1}]  }
   0x1   :  { %11 = vsyncpa [#allocation3 + $0x1], 0 }
   0x2   :  { %12 = vsyncpa [#allocation5], 0 }
   0x3   :  { %14 = vsyncpa [#allocation5 + $0x1], 0  ;;  %s847_s12 = smov 0   ;;  %s849_s13 = smov 0  }
   0x4   :  { %s851_s14 = smov 0   ;;  %s853_s15 = smov 0  }
   0x5   :  { %s855_s16 = smov 0   ;;  %s857_s17 = smov 0  }
   0x6 LB: > { %s619_s18 = sadd.s32 4294967295, %s821_s17   ;;  %s39_s19 = sadd.s32 1, %s817_s16  ;;  %s821_s17 = sphi %s857_s17, %s20_s17   ;;  %s817_s16 = sphi %s855_s16, %s1035_s16   ;;  %s813_s15 = sphi %s853_s15, %s1034_s15   ;;  %s809_s14 = sphi %s851_s14, %s1033_s14   ;;  %s805_s13 = sphi %s849_s13, %s1032_s13   ;;  %s801_s12 = sphi %s847_s12, %s1031_s12  }
   0x7   : > { %p41_p0 = scmp.ge.s32.totalorder %s39_s19, 2  ;;  %s50_s20 = sadd.s32 1, %s809_s14 }
   0x8   : > { %p57_p1 = scmp.ne.s32.totalorder %s809_s14, %s805_s13  ;;  %p58_p2 = scmp.eq.s32.totalorder %s821_s17, 0 }
   0x9   : > { %s1037_s19 = smov (%p41_p0, %s39_s19), 0  ;;  %p63_p4 = scmp.ne.s32.totalorder %s805_s13, %s801_s12 }
   0xa   : > { %p883_p3 = por %p58_p2, %p57_p1  ;;  %s45_s22 = ssub.s32 %s817_s16, %s1037_s19 }
   0xb   : > { %p64_p5 = scmp.eq.s32.totalorder %s619_s18, 0  ;;  %p48_p6 = scmp.eq.s32.totalorder %s45_s22, 0 }
   0xc   : > { %p655_p8 = scmp.lt.s32.totalorder %s821_s17, 2  ;;  %s899_s25 = sand.u32 1, %s809_s14  }
   0xd   : > { %p890_p7 = por %p64_p5, %p63_p4  ;;  %s642_s26 = sshll.u32 %s817_s16, 7 }
   0xe   : > { %s896_s24 = scalar_select %p48_p6, %s809_s14, %s50_s20  }
   0xf   : > { %s1024_s23 = scalar_select %p890_p7, 1, 0 }
  0x10   : > { %s623_s27 = sshll.u32 %s899_s25, 3  ;;  %s906_s30 = scalar_lea.hbm %s1018_s0, %s642_s26 }
  0x11   : > { %s177_s4 = scalar_lea.vmem [#allocation2], %s623_s27  ;;  %p910_p9 = pnand %p655_p8, %p883_p3 }
  0x12   : > { %s188_s5 = sshll.u32 %s177_s4, 4  ;;  %s174_s7 = scalar_lea.sflag [#allocation3], %s899_s25  ;;  %s914_s5 = int_to_ptr.vmem [resolvable:$true] %s188_s5 }
  0x13   : > { %s707_s8 = scalar_lea.hbm %s906_s30, 128  ;;  %p709_p13 = pneg %p910_p9 }
  0x14   : > { %p708_p12 = scmp.ne.s32.totalorder %s906_s30, %s707_s8  ;;  %s712_s11 = scalar_lea.hbm %s1018_s0, 256 }
  0x15   : > { %p713_p2 = scmp.lt.u32.totalorder %s906_s30, %s1018_s0  ;;  %p714_p3 = scmp.lt.u32.totalorder %s712_s11, %s707_s8 }
  0x16   : > { %p710_p0 = pnand %p709_p13, %p708_p12  ;;  %p716_p5 = scmp.lt.u32.totalorder %s707_s8, %s906_s30 }
  0x17   : > { %p715_p4 = por %p714_p3, %p713_p2 }
  0x18   : > { %p711_p1 = pneg %p710_p0 }
  0x19   : > { %p717_p6 = por %p716_p5, %p715_p4 }
  0x1b   : > { %p718_p8 = pnand %p717_p6, %p711_p1 }
  0x1d   : > { %721 = shalt.err (!%p718_p8)
}
  0x1e   : > { %s722_s20 = scalar_lea.vmem %s914_s5, 128  ;;  %s823_s21 = smov [#allocation2]  }
  0x1f   : > { %p723_p12 = scmp.ne.s32.totalorder %s914_s5, %s722_s20  ;;  %s727_s22 = sshll.u32 %s823_s21, 4  ;;  %s728_s22 = int_to_ptr.vmem [resolvable:$false] %s727_s22 }
  0x20   : > { %s729_s26 = scalar_lea.vmem %s728_s22, 256  ;;  %p730_p11 = scmp.lt.s32.totalorder %s914_s5, %s728_s22 }
  0x21   : > { %p725_p0 = pnand %p723_p12, %p709_p13  ;;  %p731_p2 = scmp.lt.s32.totalorder %s729_s26, %s722_s20 }
  0x23   : > { %p726_p10 = pneg %p725_p0  ;;  %p732_p3 = por %p731_p2, %p730_p11 }
  0x25   : > { %p733_p4 = pnand %p732_p3, %p726_p10 }
  0x27   : > { %736 = shalt.err (!%p733_p4)
}
  0x28   : > { %651 = dma.hbm_to_vmem [thread:$0]  (!%p910_p9), %s906_s30, 128, %s914_s5, %s174_s7  }
  0x29   : > { %p1026_p1 = scmp.lt.s32.totalorder %s821_s17, 3  ;;  %p1027_p5 = scmp.ge.s32.totalorder %s821_s17, 1 }
  0x2a   : > { %s626_s28 = sshll.u32 %s899_s25, 1  ;;  %s643_s29 = sshll.u32 %s817_s16, 5 }
  0x2b   : > { %p948_p6 = pnand %p1027_p5, %p1026_p1  ;;  %s957_s9 = scalar_lea.hbm %s1019_s1, %s643_s29 }
  0x2c   : > { %s199_s10 = scalar_lea.vmem [#allocation4], %s626_s28  ;;  %s196_s30 = scalar_lea.sflag [#allocation5], %s899_s25 }
  0x2d   : > { %s1028_s27 = scalar_select %p948_p6, 1, 0 }
  0x2e   : > { %s210_s11 = sshll.u32 %s199_s10, 4  ;;  %s737_s5 = scalar_lea.hbm %s957_s9, 32  ;;  %s211_s11 = int_to_ptr.vmem [resolvable:$true] %s210_s11 }
  0x2f   : > { %p738_p10 = scmp.ne.s32.totalorder %s957_s9, %s737_s5  ;;  %s742_s18 = scalar_lea.hbm %s1019_s1, 64 }
  0x30   : > { %p743_p12 = scmp.lt.u32.totalorder %s957_s9, %s1019_s1  ;;  %p744_p0 = scmp.lt.u32.totalorder %s742_s18, %s737_s5 }
  0x31   : > { %p740_p11 = pnand %p738_p10, %p709_p13  ;;  %p746_p3 = scmp.lt.u32.totalorder %s737_s5, %s957_s9 }
  0x32   : > { %p745_p2 = por %p744_p0, %p743_p12 }
  0x33   : > { %p741_p8 = pneg %p740_p11 }
  0x34   : > { %p747_p4 = por %p746_p3, %p745_p2 }
  0x36   : > { %p748_p1 = pnand %p747_p4, %p741_p8 }
  0x38   : > { %751 = shalt.err (!%p748_p1)
}
  0x39   : > { %s752_s25 = scalar_lea.vmem %s211_s11, 32  ;;  %s824_s22 = smov [#allocation4]  }
  0x3a   : > { %p753_p5 = scmp.ne.s32.totalorder %s211_s11, %s752_s25  ;;  %s757_s26 = sshll.u32 %s824_s22, 4  ;;  %s758_s26 = int_to_ptr.vmem [resolvable:$false] %s757_s26 }
  0x3b   : > { %s759_s28 = scalar_lea.vmem %s758_s26, 64  ;;  %p760_p7 = scmp.lt.s32.totalorder %s211_s11, %s758_s26 }
  0x3c   : > { %p755_p10 = pnand %p753_p5, %p709_p13  ;;  %p761_p6 = scmp.lt.s32.totalorder %s759_s28, %s752_s25 }
  0x3e   : > { %p756_p11 = pneg %p755_p10  ;;  %p762_p0 = por %p761_p6, %p760_p7 }
  0x40   : > { %p763_p12 = pnand %p762_p0, %p756_p11 }
  0x42   : > { %766 = shalt.err (!%p763_p12)
}
  0x43   : > { %654 = dma.hbm_to_vmem [thread:$0]  (!%p910_p9), %s957_s9, 32, %s211_s11, %s196_s30  }
  0x44   : > { %p1029_p8 = scmp.ne.s32.totalorder %s1028_s27, 0 }
  0x45   : > { %s221_s29 = sand.u32 (!%p1029_p8), 1, %s805_s13   ;;  %p1030_p13 = scmp.ne.s32.totalorder (!%p1029_p8), %s1024_s23, 0 }
  0x46   : > { %219 = sbr.rel (%p1029_p8) target bundleno = 312 (0x138), region = 28  ;;  %s630_s4 = sshll.u32 (!%p1029_p8), %s221_s29, 3 }
  0x47   : > { %s222_s8 = scalar_lea.sflag (!%p1029_p8), [#allocation3], %s221_s29  ;;  %s225_s10 = scalar_lea.vmem (!%p1029_p8), [#allocation2], %s630_s4 }
  0x4d   : > { %792 = dma.done.wait (%p1030_p13), %s222_s8, 128  }
  0x4e   : > { %794 = vsyncadd (%p1030_p13), %s222_s8, 4294967168  ;;  %s631_s5 = sshll.u32 %s221_s29, 1  ;;  %s231_s7 = scalar_lea.sflag [#allocation5], %s221_s29 }
  0x4f   : > { %s234_s6 = scalar_lea.vmem [#allocation4], %s631_s5 }
  0x50   : > { %796 = dma.done.wait (%p1030_p13), %s231_s7, 32  }
  0x51   : > { %798 = vsyncadd (%p1030_p13), %s231_s7, 4294967264  ;;  %v293_v0 = vlaneseq  ;;  %v292_v4 = vld [vmem:[%s234_s6] sm:$0x3]  ;;  %v291_v5 = vld [vmem:[%s225_s10] sm:$0xff]  ;;  %vm456_vm0 = vcmask 1042432   ;;  %v825_v11 = vmov 1.0  }
  0x52   : > { %v382_v8 = vmul.f32 %v291_v5, %v291_v5  ;;  %v310_v9 = vcombine.high %v291_v5, %v291_v5  ;;  %v826_v12 = vmov 0.0   ;;  %p272_p7 = scmp.lt.s32.totalorder %s813_s15, 1  ;;  %vm287_vm3 = vcmask 23552  }
  0x53   : > { %v294_v1 = vshrl.u32 %v293_v0, 7  ;;  %vm289_vm4 = vcmask 2048   ;;  %vm466_vm5 = vcmask 1043456  }
  0x54   : > { %v384_v10 = vcombine.high %v382_v8, %v382_v8  ;;  %376 = vmatprep.mubr.f32.mxu0 %v310_v9  ;;  %s1039_s15 = smov (!%p272_p7, %s813_s15), 1 }
  0x55   : > { %v301_v2 = vsub.s32 1, %v294_v1  ;;  %v297_v3 = vsub.s32 0, %v294_v1  ;;  %s632_s23 = sshll.u32 %s1039_s15, 3  ;;  %s633_s27 = sshll.u32 %s1039_s15, 2 }
  0x56   : > { %450 = vmatprep.mubr.f32.mxu1 %v384_v10  ;;  %s275_s30 = scalar_lea.vmem %s1020_s2, %s632_s23  ;;  %s281_s20 = scalar_lea.vmem %s1021_s3, %s633_s27 }
  0x57   : > { %v302_v6 = vrot.slane %v292_v4, %v301_v2  ;;  %v298_v7 = vrot.slane %v292_v4, %v297_v3  ;;  %288 = vst.msk [vmem:[%s275_s30] sm:$0xff] %vm287_vm3, %v826_v12 }
  0x58   : > { %290 = vst.msk [vmem:[%s281_s20] sm:$0x7] %vm289_vm4, %v826_v12 }
  0x59   : > { %vm304_vm1 = vcmp.eq.s32.totalorder %v302_v6, %v294_v1  ;;  %vm303_vm2 = vcmp.eq.s32.totalorder %v298_v7, %v294_v1 }
  0x5a   : > { %638 = vmatprep.subr.msk.mxu1 %vm304_vm1, %v825_v11  ;;  %636 = vmatprep.subr.msk.mxu0 %vm304_vm1, %v825_v11  ;;  %v634_v13 = vsel %vm303_vm2, 1.0, %v826_v12  ;;  %v635_v14 = vsel %vm304_vm1, 1.0, %v826_v12 }
  0x5b   : > { %639 = vmatpush1.xpose.msk.msra.mxu1 %vm303_vm2, %v825_v11  ;;  %637 = vmatpush1.xpose.msk.msra.mxu0 %vm303_vm2, %v825_v11  ;;  %v457_v15 = vsel %vm456_vm0, %v634_v13, 0.0  ;;  %v458_v16 = vsel %vm456_vm0, %v635_v14, 0.0 }
  0x5c   : > { %v459_v17 = vadd.f32 %v458_v16, %v457_v15 }
  0x5e   : > { %451 = vmatmul.mubr.f32.vlgmr.msra.gmra.mrb[0].mxu1 %v382_v8  ;;  %377 = vmatmul.mubr.f32.vlgmr.msra.gmra.mrb[0].mxu0 %v291_v5  ;;  %v462_v24 = vld [vmem:[%s275_s30] sm:$0xff] }
  0x5f   : > { %460 = vadd.xlane.f32.xlu0 %v459_v17  ;;  %v471_v18 = vld [vmem:[%s281_s20] sm:$0x7] }
  0xec   : > { %v461_v19 = vpop.xlane.xlu0 %460 }
  0xed   : > { %v472_v20 = vadd.f32 %v471_v18, %v461_v19 }
  0xef   : > { %474 = vst.msk [vmem:[%s281_s20] sm:$0x7] %vm289_vm4, %v472_v20 }
 0x131   : > { %v452_v21 = vpop.f32.mrb[0].mxu1  ;;  %v378_v22 = vpop.f32.mrb[0].mxu0 }
 0x132   : > { %v464_v23 = vrot.slane %v452_v21, 4  ;;  %v454_v25 = vpop.f32.mrb[1].mxu1  ;;  %v380_v26 = vpop.f32.mrb[1].mxu0 }
 0x134   : > { %v467_v27 = vsel %vm466_vm5, %v378_v22, %v464_v23 }
 0x135   : > { %v468_v28 = vadd.f32 %v467_v27, %v462_v24 }
 0x137   : > { %470 = vst.msk [vmem:[%s275_s30] sm:$0xff] %vm287_vm3, %v468_v28 }
 0x138 PF: > { %s20_s17 = sadd.s32 1, %s821_s17   ;;  %s1031_s12 = smov %s805_s13 }
 0x139   : > { %p17_p9 = scmp.ge.s32.totalorder %s20_s17, 4   ;;  %s1032_s13 = smov %s809_s14 }
 0x13a   : > { %s1033_s14 = smov %s896_s24  ;;  %s1034_s15 = smov %s817_s16 }
 0x13b   : > { %s1035_s16 = smov %s1037_s19  ;;  %19 = sbr.rel (!%p17_p9) target bundleno = 6 (0x6), region = 97 }
 0x142   :  { %514 = vsyncpa [#allocation3], 1 }
 0x143   :  { %516 = vsyncpa [#allocation3 + $0x1], 1 }
 0x144   :  { %517 = vsyncpa [#allocation5], 1 }
 0x145   :  { %519 = vsyncpa [#allocation5 + $0x1], 1 }

</bundles_post_ra>
